<compile_context>
chip_gen: v7x
topology: tpu7x:2x2x1
jax: 0.10.0
libtpu: 0.0.40
codegen_flags: <defaults>
</compile_context>

<pallas_src>
import jax
import jax.numpy as jnp
from jax.experimental import pallas as pl
from jax.experimental.pallas import tpu as pltpu

EMB = 50          # constant.embedding
VOCAB = 352899
OUT = 1024


# ----------------------------------------------------------------------------
# Fused gather + linear kernel (all DMAs issued up-front, overlapped)
# ----------------------------------------------------------------------------
def _x2_kernel(idx_ref, emb_hbm, w_hbm, b_hbm, o_ref,
               x_scr, w_scr, b_scr, sem):
    """Fused Embedding-gather + Linear.

    idx_ref : SMEM (B,)        int32   row indices into the embedding table
    emb_hbm : HBM  (V, EMB)    f32     embedding table (never fully loaded)
    w_hbm   : HBM  (EMB, OUT)  bf16    linear weight (transposed vs. torch)
    b_hbm   : HBM  (1, OUT)    f32     linear bias
    o_ref   : VMEM (B, OUT)    f32     output
    x_scr   : VMEM (B, EMB)    f32     gathered embedding rows (scratch)
    w_scr   : VMEM (EMB, OUT)  bf16    weight staging buffer (scratch)
    b_scr   : VMEM (1, OUT)    f32     bias staging buffer (scratch)
    sem     : DMA semaphores (B + 2,)
    """
    B = o_ref.shape[0]

    def row_copy(r):
        return pltpu.make_async_copy(
            emb_hbm.at[pl.ds(idx_ref[r], 1), :],   # (1, EMB) slice of HBM table
            x_scr.at[pl.ds(r, 1), :],              # (1, EMB) slot in VMEM scratch
            sem.at[r],
        )

    w_copy = pltpu.make_async_copy(w_hbm, w_scr, sem.at[B])
    b_copy = pltpu.make_async_copy(b_hbm, b_scr, sem.at[B + 1])

    # Issue EVERY DMA first so the weight/bias streams overlap the row gathers.
    w_copy.start()
    b_copy.start()
    for r in range(B):
        row_copy(r).start()

    # Then wait on all of them before touching the data.
    for r in range(B):
        row_copy(r).wait()
    w_copy.wait()
    b_copy.wait()

    y = jnp.dot(x_scr[...].astype(jnp.bfloat16), w_scr[...],
                preferred_element_type=jnp.float32)
    o_ref[...] = y + b_scr[...]


def x2_forward(x, params):
    """x: (B, 1) int32 indices -> (B, 1024) f32  (or (1024,) when B == 1,
    matching torch's .squeeze())."""
    B = x.shape[0]
    idx = x.reshape(B).astype(jnp.int32)
    w = params["w"].astype(jnp.bfloat16)            # (EMB, OUT) bf16 stream
    b = params["b"].reshape(1, OUT).astype(jnp.float32)

    out = pl.pallas_call(
        _x2_kernel,
        out_shape=jax.ShapeDtypeStruct((B, OUT), jnp.float32),
        in_specs=[
            pl.BlockSpec(memory_space=pltpu.MemorySpace.SMEM),   # indices
            pl.BlockSpec(memory_space=pl.ANY),                   # embedding table (HBM)
            pl.BlockSpec(memory_space=pl.ANY),                   # weight (HBM, bf16)
            pl.BlockSpec(memory_space=pl.ANY),                   # bias (HBM)
        ],
        out_specs=pl.BlockSpec(memory_space=pltpu.MemorySpace.VMEM),
        scratch_shapes=[
            pltpu.VMEM((B, EMB), jnp.float32),       # gathered rows
            pltpu.VMEM((EMB, OUT), jnp.bfloat16),    # weight staging
            pltpu.VMEM((1, OUT), jnp.float32),       # bias staging
            pltpu.SemaphoreType.DMA((B + 2,)),       # B row sems + w + b
        ],
    )(idx, params["e01"], w, b)

    if B == 1:                       # torch .squeeze() drops the batch dim
        out = out.reshape(OUT)
    return out


# ----------------------------------------------------------------------------
# Deterministic parameter construction
# ----------------------------------------------------------------------------
def build_params(seed=0):
    key = jax.random.PRNGKey(seed)
    k1, k2, k3 = jax.random.split(key, 3)
    return {
        "e01": 0.05 * jax.random.normal(k1, (VOCAB, EMB), jnp.float32),
        # torch nn.Linear stores weight as (out, in); keep the transposed
        # (in, out) layout so the kernel feeds the MXU directly.
        "w": 0.05 * jax.random.normal(k2, (EMB, OUT), jnp.float32),
        "b": 0.05 * jax.random.normal(k3, (OUT,), jnp.float32),
    }


# ----------------------------------------------------------------------------
if __name__ == "__main__":
    B = 2
    P = build_params(0)

    key = jax.random.PRNGKey(0)
    x = jax.random.randint(key, (B, 1), 0, VOCAB, dtype=jnp.int32)

    fwd = jax.jit(x2_forward)
    y = fwd(x, P)
    jax.block_until_ready(y)
    assert y.shape == (B, OUT)

    # Pure-JAX reference: gather + x @ W + b (f32, highest precision).
    idx = x.reshape(B)
    ref = jnp.dot(jnp.take(P["e01"], idx, axis=0), P["w"],
                  precision=jax.lax.Precision.HIGHEST) + P["b"]
    assert jnp.allclose(y, ref, atol=2e-3, rtol=2e-3), \
        float(jnp.max(jnp.abs(y - ref)))

    print("KERNEL_OK")
</pallas_src>

<mosaic_0001>
module attributes {stable_mosaic.version = 11 : i64} {
  func.func @_x2_kernel(%arg0: memref<2xi32, #tpu.memory_space<smem>>, %arg1: memref<352899x50xf32, #tpu.memory_space<any>>, %arg2: memref<50x1024xbf16, #tpu.memory_space<any>>, %arg3: memref<1x1024xf32, #tpu.memory_space<any>>, %arg4: memref<2x1024xf32, #tpu.memory_space<vmem>>, %arg5: memref<2x50xf32, #tpu.memory_space<vmem>>, %arg6: memref<50x1024xbf16, #tpu.memory_space<vmem>>, %arg7: memref<1x1024xf32, #tpu.memory_space<vmem>>, %arg8: memref<4x!tpu.dma_semaphore, #tpu.memory_space<semaphore_mem>>) attributes {dimension_semantics = [], scalar_prefetch = 0 : i64, scratch_operands = 4 : i64, tpu.core_type = #tpu.core_type<tc>} {
    %c2_i32 = arith.constant 2 : i32
    %0 = tpu.memref_slice %arg8[%c2_i32] : memref<4x!tpu.dma_semaphore, #tpu.memory_space<semaphore_mem>> -> memref<1x!tpu.dma_semaphore, #tpu.memory_space<semaphore_mem>>
    %1 = tpu.memref_squeeze %0 : memref<1x!tpu.dma_semaphore, #tpu.memory_space<semaphore_mem>> -> memref<!tpu.dma_semaphore, #tpu.memory_space<semaphore_mem>>
    tpu.enqueue_dma source(%arg2 : memref<50x1024xbf16, #tpu.memory_space<any>>) target(%arg6 : memref<50x1024xbf16, #tpu.memory_space<vmem>>) target_semaphore(%1 : memref<!tpu.dma_semaphore, #tpu.memory_space<semaphore_mem>>)
    %c3_i32 = arith.constant 3 : i32
    %2 = tpu.memref_slice %arg8[%c3_i32] : memref<4x!tpu.dma_semaphore, #tpu.memory_space<semaphore_mem>> -> memref<1x!tpu.dma_semaphore, #tpu.memory_space<semaphore_mem>>
    %3 = tpu.memref_squeeze %2 : memref<1x!tpu.dma_semaphore, #tpu.memory_space<semaphore_mem>> -> memref<!tpu.dma_semaphore, #tpu.memory_space<semaphore_mem>>
    tpu.enqueue_dma source(%arg3 : memref<1x1024xf32, #tpu.memory_space<any>>) target(%arg7 : memref<1x1024xf32, #tpu.memory_space<vmem>>) target_semaphore(%3 : memref<!tpu.dma_semaphore, #tpu.memory_space<semaphore_mem>>)
    %c0 = arith.constant 0 : index
    %4 = memref.load %arg0[%c0] : memref<2xi32, #tpu.memory_space<smem>>
    %c0_i32 = arith.constant 0 : i32
    %c0_i32_0 = arith.constant 0 : i32
    %5 = tpu.memref_slice %arg1[%4, %c0_i32_0] : memref<352899x50xf32, #tpu.memory_space<any>> -> memref<1x50xf32, #tpu.memory_space<any>>
    %c0_i32_1 = arith.constant 0 : i32
    %c0_i32_2 = arith.constant 0 : i32
    %6 = tpu.memref_slice %arg5[%c0_i32_1, %c0_i32_2] : memref<2x50xf32, #tpu.memory_space<vmem>> -> memref<1x50xf32, #tpu.memory_space<vmem>>
    %7 = tpu.memref_slice %arg8[%c0_i32] : memref<4x!tpu.dma_semaphore, #tpu.memory_space<semaphore_mem>> -> memref<1x!tpu.dma_semaphore, #tpu.memory_space<semaphore_mem>>
    %8 = tpu.memref_squeeze %7 : memref<1x!tpu.dma_semaphore, #tpu.memory_space<semaphore_mem>> -> memref<!tpu.dma_semaphore, #tpu.memory_space<semaphore_mem>>
    tpu.enqueue_dma source(%5 : memref<1x50xf32, #tpu.memory_space<any>>) target(%6 : memref<1x50xf32, #tpu.memory_space<vmem>>) target_semaphore(%8 : memref<!tpu.dma_semaphore, #tpu.memory_space<semaphore_mem>>)
    %c1 = arith.constant 1 : index
    %9 = memref.load %arg0[%c1] : memref<2xi32, #tpu.memory_space<smem>>
    %c1_i32 = arith.constant 1 : i32
    %c0_i32_3 = arith.constant 0 : i32
    %10 = tpu.memref_slice %arg1[%9, %c0_i32_3] : memref<352899x50xf32, #tpu.memory_space<any>> -> memref<1x50xf32, #tpu.memory_space<any>>
    %c1_i32_4 = arith.constant 1 : i32
    %c0_i32_5 = arith.constant 0 : i32
    %11 = tpu.memref_slice %arg5[%c1_i32_4, %c0_i32_5] : memref<2x50xf32, #tpu.memory_space<vmem>> -> memref<1x50xf32, #tpu.memory_space<vmem>>
    %12 = tpu.memref_slice %arg8[%c1_i32] : memref<4x!tpu.dma_semaphore, #tpu.memory_space<semaphore_mem>> -> memref<1x!tpu.dma_semaphore, #tpu.memory_space<semaphore_mem>>
    %13 = tpu.memref_squeeze %12 : memref<1x!tpu.dma_semaphore, #tpu.memory_space<semaphore_mem>> -> memref<!tpu.dma_semaphore, #tpu.memory_space<semaphore_mem>>
    tpu.enqueue_dma source(%10 : memref<1x50xf32, #tpu.memory_space<any>>) target(%11 : memref<1x50xf32, #tpu.memory_space<vmem>>) target_semaphore(%13 : memref<!tpu.dma_semaphore, #tpu.memory_space<semaphore_mem>>)
    %c0_6 = arith.constant 0 : index
    %14 = memref.load %arg0[%c0_6] : memref<2xi32, #tpu.memory_space<smem>>
    %c0_i32_7 = arith.constant 0 : i32
    %c0_i32_8 = arith.constant 0 : i32
    %15 = tpu.memref_slice %arg1[%14, %c0_i32_8] : memref<352899x50xf32, #tpu.memory_space<any>> -> memref<1x50xf32, #tpu.memory_space<any>>
    %c0_i32_9 = arith.constant 0 : i32
    %c0_i32_10 = arith.constant 0 : i32
    %16 = tpu.memref_slice %arg5[%c0_i32_9, %c0_i32_10] : memref<2x50xf32, #tpu.memory_space<vmem>> -> memref<1x50xf32, #tpu.memory_space<vmem>>
    %17 = tpu.memref_slice %arg8[%c0_i32_7] : memref<4x!tpu.dma_semaphore, #tpu.memory_space<semaphore_mem>> -> memref<1x!tpu.dma_semaphore, #tpu.memory_space<semaphore_mem>>
    %18 = tpu.memref_squeeze %17 : memref<1x!tpu.dma_semaphore, #tpu.memory_space<semaphore_mem>> -> memref<!tpu.dma_semaphore, #tpu.memory_space<semaphore_mem>>
    tpu.wait_dma2 semaphore(%18 : memref<!tpu.dma_semaphore, #tpu.memory_space<semaphore_mem>>) src(%15 : memref<1x50xf32, #tpu.memory_space<any>>) dst(%16 : memref<1x50xf32, #tpu.memory_space<vmem>>)
    %c1_11 = arith.constant 1 : index
    %19 = memref.load %arg0[%c1_11] : memref<2xi32, #tpu.memory_space<smem>>
    %c1_i32_12 = arith.constant 1 : i32
    %c0_i32_13 = arith.constant 0 : i32
    %20 = tpu.memref_slice %arg1[%19, %c0_i32_13] : memref<352899x50xf32, #tpu.memory_space<any>> -> memref<1x50xf32, #tpu.memory_space<any>>
    %c1_i32_14 = arith.constant 1 : i32
    %c0_i32_15 = arith.constant 0 : i32
    %21 = tpu.memref_slice %arg5[%c1_i32_14, %c0_i32_15] : memref<2x50xf32, #tpu.memory_space<vmem>> -> memref<1x50xf32, #tpu.memory_space<vmem>>
    %22 = tpu.memref_slice %arg8[%c1_i32_12] : memref<4x!tpu.dma_semaphore, #tpu.memory_space<semaphore_mem>> -> memref<1x!tpu.dma_semaphore, #tpu.memory_space<semaphore_mem>>
    %23 = tpu.memref_squeeze %22 : memref<1x!tpu.dma_semaphore, #tpu.memory_space<semaphore_mem>> -> memref<!tpu.dma_semaphore, #tpu.memory_space<semaphore_mem>>
    tpu.wait_dma2 semaphore(%23 : memref<!tpu.dma_semaphore, #tpu.memory_space<semaphore_mem>>) src(%20 : memref<1x50xf32, #tpu.memory_space<any>>) dst(%21 : memref<1x50xf32, #tpu.memory_space<vmem>>)
    %c2_i32_16 = arith.constant 2 : i32
    %24 = tpu.memref_slice %arg8[%c2_i32_16] : memref<4x!tpu.dma_semaphore, #tpu.memory_space<semaphore_mem>> -> memref<1x!tpu.dma_semaphore, #tpu.memory_space<semaphore_mem>>
    %25 = tpu.memref_squeeze %24 : memref<1x!tpu.dma_semaphore, #tpu.memory_space<semaphore_mem>> -> memref<!tpu.dma_semaphore, #tpu.memory_space<semaphore_mem>>
    tpu.wait_dma2 semaphore(%25 : memref<!tpu.dma_semaphore, #tpu.memory_space<semaphore_mem>>) src(%arg2 : memref<50x1024xbf16, #tpu.memory_space<any>>) dst(%arg6 : memref<50x1024xbf16, #tpu.memory_space<vmem>>)
    %c3_i32_17 = arith.constant 3 : i32
    %26 = tpu.memref_slice %arg8[%c3_i32_17] : memref<4x!tpu.dma_semaphore, #tpu.memory_space<semaphore_mem>> -> memref<1x!tpu.dma_semaphore, #tpu.memory_space<semaphore_mem>>
    %27 = tpu.memref_squeeze %26 : memref<1x!tpu.dma_semaphore, #tpu.memory_space<semaphore_mem>> -> memref<!tpu.dma_semaphore, #tpu.memory_space<semaphore_mem>>
    tpu.wait_dma2 semaphore(%27 : memref<!tpu.dma_semaphore, #tpu.memory_space<semaphore_mem>>) src(%arg3 : memref<1x1024xf32, #tpu.memory_space<any>>) dst(%arg7 : memref<1x1024xf32, #tpu.memory_space<vmem>>)
    %c0_18 = arith.constant 0 : index
    %c0_19 = arith.constant 0 : index
    %28 = vector.load %arg5[%c0_18, %c0_19] : memref<2x50xf32, #tpu.memory_space<vmem>>, vector<2x50xf32>
    %29 = arith.truncf %28 : vector<2x50xf32> to vector<2x50xbf16>
    %c0_20 = arith.constant 0 : index
    %c0_21 = arith.constant 0 : index
    %30 = vector.load %arg6[%c0_20, %c0_21] : memref<50x1024xbf16, #tpu.memory_space<vmem>>, vector<50x1024xbf16>
    %cst = arith.constant dense<0.000000e+00> : vector<2x1024xf32>
    %31 = tpu.matmul %29, %30, %cst {dimension_numbers = #tpu.dot_dimension_numbers<[1], [0], [0], [1], [0, 0, 1, 1], [], []>} : vector<2x50xbf16>, vector<50x1024xbf16>, vector<2x1024xf32> -> vector<2x1024xf32>
    %c0_22 = arith.constant 0 : index
    %c0_23 = arith.constant 0 : index
    %32 = vector.load %arg7[%c0_22, %c0_23] : memref<1x1024xf32, #tpu.memory_space<vmem>>, vector<1x1024xf32>
    %33 = vector.broadcast %32 : vector<1x1024xf32> to vector<2x1024xf32>
    %34 = arith.addf %31, %33 : vector<2x1024xf32>
    %c0_24 = arith.constant 0 : index
    %c0_25 = arith.constant 0 : index
    %35 = vector.load %arg4[%c0_24, %c0_25] : memref<2x1024xf32, #tpu.memory_space<vmem>>, vector<2x1024xf32>
    tpu.vector_store %arg4[%c0_24, %c0_25], %34 {strides = array<i32>} : memref<2x1024xf32, #tpu.memory_space<vmem>>, vector<2x1024xf32>,
    return
  }
}

</mosaic_0001>

<bundles_post_ra>
// kernel: x2_forward.1
= control target key start
LH: loop header
LB: loop body
LE: loop exit
PB: predicated region body
PF: predicated region fallthrough
CT: control target
= control target key end

     0   :  { %9 = vsyncpa [#allocation8], 0  ;;  %s1070_s0 = inlined_call_operand.vmem [shape: s32[2], index: 0, kind: input, shape index: {}]   ;;  %s1071_s1 = inlined_call_operand.hbm [shape: f32[352899,50], index: 1, kind: input, shape index: {}]   ;;  %s1072_s2 = inlined_call_operand.vmem [shape: bf16[50,1024], index: 2, kind: input, shape index: {}]   ;;  %s1073_s3 = inlined_call_operand.vmem [shape: f32[1,1024], index: 3, kind: input, shape index: {}]   ;;  %s1074_s4 = inlined_call_operand.hbm [shape: f32[2,1024], index: 4, kind: output, shape index: {}]  }
   0x1   :  { %10 = vsyncpa [#allocation7], 0  ;;  %s17_s17 = sshll.u32 %s1070_s0, 4  ;;  %s18_s17 = int_to_ptr.vmem [resolvable:$true] %s17_s17 }
   0x2   :  { %s784_s18 = scalar_lea.vmem %s18_s17, 16  ;;  %p789_p1 = scmp.lt.s32.totalorder %s18_s17, %s18_s17 }
   0x3   :  { %p785_p0 = scmp.ne.s32.totalorder %s18_s17, %s784_s18  ;;  %p790_p2 = scmp.lt.s32.totalorder %s784_s18, %s784_s18 }
   0x5   :  { %p791_p3 = por %p790_p2, %p789_p1 }
   0x7   :  { %p792_p4 = pnand %p791_p3, %p785_p0 }
   0x9   :  { %795 = shalt.err (!%p792_p4)
}
   0xa   :  { %s878_s19 = smov [#allocation6]  }
   0xb   :  { %20 = dma.vmem_to_smem %s18_s17, 16, %s878_s19, [#allocation8]  }
   0xc   :  { %866 = dma.done.wait [#allocation8], 16  }
   0xd   :  { %867 = vsyncadd [#allocation8], 4294967280 }
   0xe   :  { %24 = sfence }
   0xf   :  { %v59_v0 = vld [vmem:[%s1072_s2] sm:$0xff]  ;;  %v61_v1 = vld [vmem:[%s1072_s2 + $0x8] sm:$0xff]  ;;  %v63_v2 = vld [vmem:[%s1072_s2 + $0x10] sm:$0xff] }
  0x10   :  { %60 = vst [vmem:[#allocation3] sm:$0xff] %v59_v0  ;;  %62 = vst [vmem:[#allocation3 + $0x8] sm:$0xff] %v61_v1  ;;  %v65_v3 = vld [vmem:[%s1072_s2 + $0x18] sm:$0xff]  ;;  %v67_v4 = vld [vmem:[%s1072_s2 + $0x20] sm:$0xff] }
  0x11   :  { %64 = vst [vmem:[#allocation3 + $0x10] sm:$0xff] %v63_v2  ;;  %v69_v5 = vld [vmem:[%s1072_s2 + $0x28] sm:$0xff]  ;;  %66 = vst [vmem:[#allocation3 + $0x18] sm:$0xff] %v65_v3  ;;  %v71_v6 = vld [vmem:[%s1072_s2 + $0x30] sm:$0xff] }
  0x12   :  { %68 = vst [vmem:[#allocation3 + $0x20] sm:$0xff] %v67_v4  ;;  %70 = vst [vmem:[#allocation3 + $0x28] sm:$0xff] %v69_v5  ;;  %v73_v7 = vld [vmem:[%s1072_s2 + $0x38] sm:$0xff]  ;;  %v75_v8 = vld [vmem:[%s1072_s2 + $0x40] sm:$0xff] }
  0x13   :  { %72 = vst [vmem:[#allocation3 + $0x30] sm:$0xff] %v71_v6  ;;  %74 = vst [vmem:[#allocation3 + $0x38] sm:$0xff] %v73_v7  ;;  %v77_v9 = vld [vmem:[%s1072_s2 + $0x48] sm:$0xff]  ;;  %v79_v10 = vld [vmem:[%s1072_s2 + $0x50] sm:$0xff] }
  0x14   :  { %76 = vst [vmem:[#allocation3 + $0x40] sm:$0xff] %v75_v8  ;;  %v81_v11 = vld [vmem:[%s1072_s2 + $0x58] sm:$0xff]  ;;  %78 = vst [vmem:[#allocation3 + $0x48] sm:$0xff] %v77_v9  ;;  %v83_v12 = vld [vmem:[%s1072_s2 + $0x60] sm:$0xff] }
  0x15   :  { %80 = vst [vmem:[#allocation3 + $0x50] sm:$0xff] %v79_v10  ;;  %82 = vst [vmem:[#allocation3 + $0x58] sm:$0xff] %v81_v11  ;;  %v85_v13 = vld [vmem:[%s1072_s2 + $0x68] sm:$0xff]  ;;  %v87_v14 = vld [vmem:[%s1072_s2 + $0x70] sm:$0xff] }
  0x16   :  { %84 = vst [vmem:[#allocation3 + $0x60] sm:$0xff] %v83_v12  ;;  %86 = vst [vmem:[#allocation3 + $0x68] sm:$0xff] %v85_v13  ;;  %v89_v15 = vld [vmem:[%s1072_s2 + $0x78] sm:$0xff]  ;;  %v91_v16 = vld [vmem:[%s1072_s2 + $0x80] sm:$0xff] }
  0x17   :  { %88 = vst [vmem:[#allocation3 + $0x70] sm:$0xff] %v87_v14  ;;  %v93_v17 = vld [vmem:[%s1072_s2 + $0x88] sm:$0xff]  ;;  %90 = vst [vmem:[#allocation3 + $0x78] sm:$0xff] %v89_v15  ;;  %v95_v18 = vld [vmem:[%s1072_s2 + $0x90] sm:$0xff] }
  0x18   :  { %92 = vst [vmem:[#allocation3 + $0x80] sm:$0xff] %v91_v16  ;;  %94 = vst [vmem:[#allocation3 + $0x88] sm:$0xff] %v93_v17  ;;  %v97_v19 = vld [vmem:[%s1072_s2 + $0x98] sm:$0xff]  ;;  %v99_v20 = vld [vmem:[%s1072_s2 + $0xa0] sm:$0xff] }
  0x19   :  { %96 = vst [vmem:[#allocation3 + $0x90] sm:$0xff] %v95_v18  ;;  %98 = vst [vmem:[#allocation3 + $0x98] sm:$0xff] %v97_v19  ;;  %v101_v21 = vld [vmem:[%s1072_s2 + $0xa8] sm:$0xff]  ;;  %v103_v22 = vld [vmem:[%s1072_s2 + $0xb0] sm:$0xff] }
  0x1a   :  { %100 = vst [vmem:[#allocation3 + $0xa0] sm:$0xff] %v99_v20  ;;  %v105_v23 = vld [vmem:[%s1072_s2 + $0xb8] sm:$0xff]  ;;  %102 = vst [vmem:[#allocation3 + $0xa8] sm:$0xff] %v101_v21  ;;  %v107_v24 = vld [vmem:[%s1072_s2 + $0xc0] sm:$0xff] }
  0x1b   :  { %104 = vst [vmem:[#allocation3 + $0xb0] sm:$0xff] %v103_v22  ;;  %106 = vst [vmem:[#allocation3 + $0xb8] sm:$0xff] %v105_v23  ;;  %v109_v25 = vld [vmem:[%s1072_s2 + $0xc8] sm:$0xff]  ;;  %v111_v26 = vld [vmem:[%s1072_s2 + $0xd0] sm:$0xff] }
  0x1c   :  { %108 = vst [vmem:[#allocation3 + $0xc0] sm:$0xff] %v107_v24  ;;  %110 = vst [vmem:[#allocation3 + $0xc8] sm:$0xff] %v109_v25  ;;  %v113_v27 = vld [vmem:[%s1072_s2 + $0xd8] sm:$0xff] }
  0x1d   :  { %112 = vst [vmem:[#allocation3 + $0xd0] sm:$0xff] %v111_v26  ;;  %114 = vst [vmem:[#allocation3 + $0xd8] sm:$0xff] %v113_v27 }
  0x1e   :  { %122 = vsyncadd [#allocation5 + $0x2], 3584  ;;  %v999_v28 = vld [vmem:[%s1073_s3] sm:$0xff] }
  0x1f   :  { %165 = vsyncadd [#allocation5 + $0x3], 128  ;;  %s166_s0 = sld [smem:[#allocation6]]  ;;  %s1001_s24 = sld [smem:[#allocation6 + $0x1]] }
  0x20   :  { %s879_s25 = smov [#allocation2]   ;;  %s880_s27 = smov [#allocation2 + $0x1]  }
  0x21   :  { %s176_s26 = sshll.u32 %s879_s25, 4  ;;  %s192_s28 = sshll.u32 %s880_s27, 4  ;;  %s1003_s26 = int_to_ptr.vmem [resolvable:$true] %s176_s26  ;;  %s1005_s28 = int_to_ptr.vmem [resolvable:$true] %s192_s28 }
  0x22   :  { %s798_s9 = scalar_lea.hbm %s1071_s1, 5646464 }
  0x25   :  { %s723_s29 = sshll.u32 %s166_s0, 4  ;;  %s725_s3 = sshll.u32 %s1001_s24, 4 }
  0x26   :  { %s168_s5 = scalar_lea.hbm %s1071_s1, %s723_s29 }
  0x27   :  { %s796_s6 = scalar_lea.hbm %s168_s5, 16  ;;  %p799_p6 = scmp.lt.u32.totalorder %s168_s5, %s1071_s1 }
  0x28   :  { %p797_p5 = scmp.ne.s32.totalorder %s168_s5, %s796_s6  ;;  %p800_p7 = scmp.lt.u32.totalorder %s798_s9, %s796_s6 }
  0x29   :  { %p802_p9 = scmp.lt.u32.totalorder %s796_s6, %s168_s5 }
  0x2a   :  { %p801_p8 = por %p800_p7, %p799_p6 }
  0x2c   :  { %p803_p10 = por %p802_p9, %p801_p8 }
  0x2e   :  { %p804_p11 = pnand %p803_p10, %p797_p5 }
  0x30   :  { %807 = shalt.err (!%p804_p11)  }
  0x31   :  { %s808_s12 = scalar_lea.vmem %s1003_s26, 16  ;;  %s812_s13 = scalar_lea.vmem %s1003_s26, 32 }
  0x32   :  { %p809_p12 = scmp.ne.s32.totalorder %s1003_s26, %s808_s12  ;;  %p813_p13 = scmp.lt.s32.totalorder %s1003_s26, %s1003_s26 }
  0x33   :  { %p814_p0 = scmp.lt.s32.totalorder %s812_s13, %s808_s12 }
  0x35   :  { %p815_p1 = por %p814_p0, %p813_p13 }
  0x37   :  { %p816_p2 = pnand %p815_p1, %p809_p12 }
  0x39   :  { %819 = shalt.err (!%p816_p2)  }
  0x3a   :  { %179 = dma.hbm_to_vmem [thread:$0]  %s168_s5, 16, %s1003_s26, [#allocation5] }
  0x3b   :  { %s182_s16 = scalar_lea.hbm %s1071_s1, %s725_s3 }
  0x3c   :  { %s820_s17 = scalar_lea.hbm %s182_s16, 16  ;;  %p823_p4 = scmp.lt.u32.totalorder %s182_s16, %s1071_s1 }
  0x3d   :  { %p821_p3 = scmp.ne.s32.totalorder %s182_s16, %s820_s17  ;;  %p824_p5 = scmp.lt.u32.totalorder %s798_s9, %s820_s17 }
  0x3e   :  { %p826_p7 = scmp.lt.u32.totalorder %s820_s17, %s182_s16 }
  0x3f   :  { %p825_p6 = por %p824_p5, %p823_p4 }
  0x41   :  { %p827_p8 = por %p826_p7, %p825_p6 }
  0x43   :  { %p828_p9 = pnand %p827_p8, %p821_p3 }
  0x45   :  { %831 = shalt.err (!%p828_p9)  }
  0x46   :  { %s832_s20 = scalar_lea.vmem %s1005_s28, 16  ;;  %p837_p11 = scmp.lt.s32.totalorder %s1005_s28, %s1003_s26 }
  0x47   :  { %p833_p10 = scmp.ne.s32.totalorder %s1005_s28, %s832_s20  ;;  %p838_p12 = scmp.lt.s32.totalorder %s812_s13, %s832_s20 }
  0x49   :  { %p839_p13 = por %p838_p12, %p837_p11 }
  0x4b   :  { %p840_p0 = pnand %p839_p13, %p833_p10 }
  0x4d   :  { %843 = shalt.err (!%p840_p0)  }
  0x4e   :  { %195 = dma.hbm_to_vmem [thread:$0]  %s182_s16, 16, %s1005_s28, [#allocation5 + $0x1] }
  0x4f   :  { %868 = dma.done.wait [#allocation5], 16 }
  0x50   :  { %869 = vsyncadd [#allocation5], 4294967280 }
  0x51   :  { %870 = dma.done.wait [#allocation5 + $0x1], 16 }
  0x52   :  { %871 = vsyncadd [#allocation5 + $0x1], 4294967280 }
  0x53   :  { %872 = dma.done.wait [#allocation5 + $0x2], 3584 }
  0x54   :  { %873 = vsyncadd [#allocation5 + $0x2], 4294963712 }
  0x55   :  { %874 = dma.done.wait [#allocation5 + $0x3], 128 }
  0x56   :  { %875 = vsyncadd [#allocation5 + $0x3], 4294967168  ;;  %v881_v29 = vmov 0   ;;  %v212_v30 = vld [vmem:[#allocation3] sm:$0xff]  ;;  %v213_v32 = vld [vmem:[#allocation3 + $0x8] sm:$0xff]  ;;  %vm426_vm0 = vcmask 1040384  }
  0x57   :  { %483 = vmatprep.mubr.bf16.mxu0 %v881_v29  ;;  %524 = vmatprep.mubr.bf16.mxu1 %v881_v29  ;;  %v216_v31 = vld [vmem:[#allocation3 + $0x20] sm:$0xff]  ;;  %v217_v34 = vld [vmem:[#allocation3 + $0x28] sm:$0xff]  ;;  %v214_v60 = vld [vmem:[#allocation3 + $0x10] sm:$0xff]  ;;  %vm422_vm1 = vcmask 408576   ;;  %s883_s1 = smov [#allocation9]  }
  0x58   :  { %v727_v33 = vcombine.high %v212_v30, %v216_v31  ;;  %v726_v35 = vcombine.low %v212_v30, %v216_v31  ;;  %v220_v36 = vld [vmem:[#allocation3 + $0x40] sm:$0xff]  ;;  %v729_v38 = vcombine.high %v213_v32, %v217_v34  ;;  %v728_v39 = vcombine.low %v213_v32, %v217_v34  ;;  %v221_v41 = vld [vmem:[#allocation3 + $0x48] sm:$0xff]  ;;  %v218_v61 = vld [vmem:[#allocation3 + $0x30] sm:$0xff]  ;;  %s667_s21 = sshll.u32 %s883_s1, 4  ;;  %s668_s21 = int_to_ptr.vmem [resolvable:$true] %s667_s21 }
  0x59   :  { %v224_v37 = vld [vmem:[#allocation3 + $0x60] sm:$0xff]  ;;  %v225_v42 = vld [vmem:[#allocation3 + $0x68] sm:$0xff]  ;;  %v215_v62 = vld [vmem:[#allocation3 + $0x18] sm:$0xff]  ;;  %v731_v2 = vcombine.high %v214_v60, %v218_v61  ;;  %v730_v10 = vcombine.low %v214_v60, %v218_v61  ;;  %s844_s22 = scalar_lea.vmem %s668_s21, 256  ;;  %p849_p2 = scmp.lt.s32.totalorder %s668_s21, %s668_s21 }
  0x5a   :  { %v735_v40 = vcombine.high %v220_v36, %v224_v37  ;;  %v228_v43 = vld [vmem:[#allocation3 + $0x80] sm:$0xff]  ;;  %451 = vmatprep.subr.bf16.mxu0 %v727_v33  ;;  %v737_v44 = vcombine.high %v221_v41, %v225_v42  ;;  %v229_v46 = vld [vmem:[#allocation3 + $0x88] sm:$0xff]  ;;  %492 = vmatprep.subr.bf16.mxu1 %v729_v38  ;;  %v734_v48 = vcombine.low %v220_v36, %v224_v37  ;;  %v219_v63 = vld [vmem:[#allocation3 + $0x38] sm:$0xff]  ;;  %v242_v33 = vlaneseq  ;;  %p845_p1 = scmp.ne.s32.totalorder %s668_s21, %s844_s22  ;;  %p850_p3 = scmp.lt.s32.totalorder %s844_s22, %s844_s22 }
  0x5b   :  { %v232_v45 = vld [vmem:[#allocation3 + $0xa0] sm:$0xff]  ;;  %v233_v47 = vld [vmem:[#allocation3 + $0xa8] sm:$0xff]  ;;  %452 = vmatpush1.bf16.msra.mxu0 %v726_v35  ;;  %493 = vmatpush1.bf16.msra.mxu1 %v728_v39  ;;  %v736_v49 = vcombine.low %v221_v41, %v225_v42  ;;  %v210_v0 = vld [vmem:[#allocation2] sm:$0x3]  ;;  %v733_v4 = vcombine.high %v215_v62, %v219_v63  ;;  %v732_v11 = vcombine.low %v215_v62, %v219_v63  ;;  %v882_v38 = vmov 1983009808  }
  0x5c   :  { %453 = vmatprep.subr.bf16.mxu0 %v735_v40  ;;  %v743_v50 = vcombine.high %v228_v43, %v232_v45  ;;  %494 = vmatprep.subr.bf16.mxu1 %v737_v44  ;;  %v745_v51 = vcombine.high %v229_v46, %v233_v47  ;;  %v236_v52 = vld [vmem:[#allocation3 + $0xc0] sm:$0x11]  ;;  %v237_v53 = vld [vmem:[#allocation3 + $0xc8] sm:$0x11]  ;;  %v742_v54 = vcombine.low %v228_v43, %v232_v45  ;;  %v222_v5 = vld [vmem:[#allocation3 + $0x50] sm:$0xff]  ;;  %v243_v34 = vshrl.u32 %v242_v33, 7  ;;  %p851_p4 = por %p850_p3, %p849_p2 }
  0x5d   :  { %v744_v55 = vcombine.low %v229_v46, %v233_v47  ;;  %v751_v56 = vcombine.high %v236_v52, %v236_v52  ;;  %v750_v57 = vcombine.low %v236_v52, %v236_v52  ;;  %v753_v58 = vcombine.high %v237_v53, %v237_v53  ;;  %v226_v6 = vld [vmem:[#allocation3 + $0x70] sm:$0xff]  ;;  %v223_v8 = vld [vmem:[#allocation3 + $0x58] sm:$0xff] }
  0x5e   :  { %v752_v59 = vcombine.low %v237_v53, %v237_v53  ;;  %v211_v7 = vpack.c.bf16 %v210_v0, %v210_v0  ;;  %v227_v9 = vld [vmem:[#allocation3 + $0x78] sm:$0xff]  ;;  %v739_v12 = vcombine.high %v222_v5, %v226_v6  ;;  %v230_v14 = vld [vmem:[#allocation3 + $0x90] sm:$0xff]  ;;  %v738_v18 = vcombine.low %v222_v5, %v226_v6  ;;  %p852_p5 = pnand %p851_p4, %p845_p1 }
  0x5f   :  { %454 = vmatpush1.bf16.msra.mxu0 %v734_v48  ;;  %495 = vmatpush1.bf16.msra.mxu1 %v736_v49  ;;  %v428_v1 = vsel %vm426_vm0, %v750_v57, 0  ;;  %v741_v13 = vcombine.high %v223_v8, %v227_v9  ;;  %v234_v15 = vld [vmem:[#allocation3 + $0xb0] sm:$0xff]  ;;  %v231_v16 = vld [vmem:[#allocation3 + $0x98] sm:$0xff]  ;;  %v740_v19 = vcombine.low %v223_v8, %v227_v9  ;;  %v244_v35 = vsub.s32 0, %v243_v34 }
  0x60   :  { %455 = vmatprep.subr.bf16.mxu0 %v743_v50  ;;  %496 = vmatprep.subr.bf16.mxu1 %v745_v51  ;;  %v434_v3 = vsel %vm426_vm0, %v752_v59, 0  ;;  %v235_v17 = vld [vmem:[#allocation3 + $0xb8] sm:$0xff]  ;;  %v747_v20 = vcombine.high %v230_v14, %v234_v15  ;;  %v238_v22 = vld [vmem:[#allocation3 + $0xd0] sm:$0x11]  ;;  %v746_v24 = vcombine.low %v230_v14, %v234_v15  ;;  %v252_v36 = vsub.s32 2, %v243_v34 }
  0x61   :  { %v749_v21 = vcombine.high %v231_v16, %v235_v17  ;;  %v239_v23 = vld [vmem:[#allocation3 + $0xd8] sm:$0x11]  ;;  %v748_v25 = vcombine.low %v231_v16, %v235_v17  ;;  %v755_v26 = vcombine.high %v238_v22, %v238_v22  ;;  %v754_v27 = vcombine.low %v238_v22, %v238_v22 }
  0x62   :  { %v757_v30 = vcombine.high %v239_v23, %v239_v23  ;;  %v756_v31 = vcombine.low %v239_v23, %v239_v23  ;;  %v248_v37 = vsub.s32 1, %v243_v34  ;;  %v626_v39 = vunpack.c.l.s4 %v882_v38 }
  0x63   :  { %456 = vmatpush1.bf16.msra.mxu0 %v742_v54  ;;  %497 = vmatpush1.bf16.msra.mxu1 %v744_v55  ;;  %v440_v32 = vsel %vm426_vm0, %v754_v27, 0  ;;  %v256_v40 = vsub.s32 3, %v243_v34  ;;  %v245_v41 = vrot.slane %v999_v28, %v244_v35  ;;  %v253_v42 = vrot.slane %v999_v28, %v252_v36 }
  0x64   :  { %758 = vmatprep.subr.msk.bf16.mxu0 %vm426_vm0, %v751_v56  ;;  %760 = vmatprep.subr.msk.bf16.mxu1 %vm426_vm0, %v753_v58  ;;  %v249_v43 = vrot.slane %v999_v28, %v248_v37  ;;  %v627_v44 = vunpack.c.0.s8 %v626_v39  ;;  %v260_v63 = vsub.s32 4, %v243_v34 }
  0x65   :  { %v257_v45 = vrot.slane %v999_v28, %v256_v40 }
  0x66   :  { %v630_v52 = vsub.s32 %v627_v44, %v243_v34 }
  0x67   :  { %458 = vmatpush1.bf16.msra.mxu0 %v428_v1  ;;  %499 = vmatpush1.bf16.msra.mxu1 %v434_v3  ;;  %v268_v1 = vsub.s32 6, %v243_v34  ;;  %v272_v3 = vsub.s32 7, %v243_v34 }
  0x68   :  { %533 = vmatprep.subr.bf16.mxu0 %v731_v2  ;;  %574 = vmatprep.subr.bf16.mxu1 %v733_v4  ;;  %v264_v2 = vsub.s32 5, %v243_v34  ;;  %v261_v4 = vrot.slane %v999_v28, %v260_v63 }
  0x69   :  { %v269_v5 = vrot.slane %v999_v28, %v268_v1 }
  0x6a   :  { %759 = vmatmul.mubr.msk.bf16.vlgmr.msra.gmra.mrb[0].mxu0 %vm422_vm1, %v211_v7  ;;  %761 = vmatmul.mubr.msk.bf16.vlgmr.msra.gmra.mrb[0].mxu1 %vm422_vm1, %v211_v7  ;;  %v265_v6 = vrot.slane %v999_v28, %v264_v2 }
  0x6b   :  { %534 = vmatpush1.bf16.msra.mxu0 %v730_v10  ;;  %575 = vmatpush1.bf16.msra.mxu1 %v732_v11 }
  0x6c   :  { %535 = vmatprep.subr.bf16.mxu0 %v739_v12  ;;  %576 = vmatprep.subr.bf16.mxu1 %v741_v13 }
  0x6d   :  { %565 = vmatprep.mubr.bf16.mxu0 %v881_v29  ;;  %606 = vmatprep.mubr.bf16.mxu1 %v881_v29  ;;  %v446_v29 = vsel %vm426_vm0, %v756_v31, 0 }
  0x6f   :  { %536 = vmatpush1.bf16.msra.mxu0 %v738_v18  ;;  %577 = vmatpush1.bf16.msra.mxu1 %v740_v19 }
  0x70   :  { %537 = vmatprep.subr.bf16.mxu0 %v747_v20  ;;  %578 = vmatprep.subr.bf16.mxu1 %v749_v21 }
  0x73   :  { %538 = vmatpush1.bf16.msra.mxu0 %v746_v24  ;;  %579 = vmatpush1.bf16.msra.mxu1 %v748_v25 }
  0x74   :  { %762 = vmatprep.subr.msk.bf16.mxu0 %vm426_vm0, %v755_v26  ;;  %764 = vmatprep.subr.msk.bf16.mxu1 %vm426_vm0, %v757_v30 }
  0x77   :  { %540 = vmatpush1.bf16.msra.mxu0 %v440_v32  ;;  %581 = vmatpush1.bf16.msra.mxu1 %v446_v29 }
  0x7a   :  { %763 = vmatmul.mubr.msk.bf16.vlgmr.msra.gmra.mrb[4].mxu0 %vm422_vm1, %v211_v7  ;;  %765 = vmatmul.mubr.msk.bf16.vlgmr.msra.gmra.mrb[4].mxu1 %vm422_vm1, %v211_v7  ;;  %v273_v7 = vrot.slane %v999_v28, %v272_v3 }
 0x13d   :  { %v485_v46 = vpop.f32.mrb[0].mxu0  ;;  %v526_v48 = vpop.f32.mrb[0].mxu1 }
 0x13e   :  { %v486_v47 = vadd.f32 %v485_v46, %v245_v41  ;;  %v487_v49 = vpop.f32.mrb[1].mxu0  ;;  %v527_v50 = vadd.f32 %v526_v48, %v253_v42  ;;  %v528_v53 = vpop.f32.mrb[1].mxu1 }
 0x13f   :  { %v488_v51 = vadd.f32 %v487_v49, %v249_v43  ;;  %v489_v54 = vpop.f32.mrb[2].mxu0  ;;  %v529_v55 = vadd.f32 %v528_v53, %v257_v45  ;;  %v530_v56 = vpop.f32.mrb[2].mxu1 }
 0x140   :  { %v490_v57 = vpop.f32.mrb[3].mxu0  ;;  %v531_v59 = vpop.f32.mrb[3].mxu1 }
 0x141   :  { %v623_v58 = vcombine.low %v486_v47, %v488_v51  ;;  %v624_v60 = vcombine.low %v527_v50, %v529_v55 }
 0x143   :  { %v631_v61 = vrot.slane %v623_v58, %v630_v52  ;;  %v638_v62 = vrot.slane %v624_v60, %v630_v52 }
 0x145   :  { %v639_v0 = vcombine.low %v631_v61, %v638_v62 }
 0x147   :  { %659 = vst [vmem:[#allocation9] sm:$0xff] %v639_v0 }
 0x14d   :  { %v567_v8 = vpop.f32.mrb[4].mxu0  ;;  %v608_v10 = vpop.f32.mrb[4].mxu1 }
 0x14e   :  { %v568_v9 = vadd.f32 %v567_v8, %v261_v4  ;;  %v569_v11 = vpop.f32.mrb[5].mxu0  ;;  %v609_v12 = vadd.f32 %v608_v10, %v269_v5  ;;  %v610_v14 = vpop.f32.mrb[5].mxu1 }
 0x14f   :  { %v570_v13 = vadd.f32 %v569_v11, %v265_v6  ;;  %v571_v15 = vpop.f32.mrb[6].mxu0  ;;  %v611_v16 = vadd.f32 %v610_v14, %v273_v7  ;;  %v612_v17 = vpop.f32.mrb[6].mxu1 }
 0x150   :  { %v572_v18 = vpop.f32.mrb[7].mxu0  ;;  %v613_v20 = vpop.f32.mrb[7].mxu1 }
 0x151   :  { %v640_v19 = vcombine.low %v568_v9, %v570_v13  ;;  %v641_v21 = vcombine.low %v609_v12, %v611_v16 }
 0x153   :  { %v648_v22 = vrot.slane %v640_v19, %v630_v52  ;;  %v655_v23 = vrot.slane %v641_v21, %v630_v52 }
 0x155   :  { %v656_v24 = vcombine.low %v648_v22, %v655_v23 }
 0x157   :  { %660 = vst [vmem:[#allocation9 + $0x8] sm:$0xff] %v656_v24 }
 0x158   :  { %855 = shalt.err (!%p852_p5)
}
 0x159   :  { %s856_s24 = scalar_lea.hbm %s1074_s4, 256 }
 0x15a   :  { %p857_p6 = scmp.ne.s32.totalorder %s1074_s4, %s856_s24  ;;  %p860_p7 = scmp.lt.u32.totalorder %s856_s24, %s1074_s4 }
 0x15c   :  { %p862_p8 = pnand %p860_p7, %p857_p6 }
 0x15e   :  { %865 = shalt.err (!%p862_p8)
}
 0x15f   :  { %670 = dma.vmem_to_hbm [thread:$0]  %s668_s21, 256, %s1074_s4, [#allocation7]  }
 0x160   :  { %876 = dma.done.wait [#allocation7], 256  }
 0x161   :  { %877 = vsyncadd [#allocation7], 4294967040 }
 0x162   :  { %674 = vsyncpa [#allocation7], 1 }
 0x163   :  { %675 = vsyncpa [#allocation8], 1 }
 0x164   :  { %676 = vsyncmov [#allocation5] }
 0x167   :  { %s677_s30 = vpop.sfrf %676 }
 0x168   :  { %p766_p9 = scmp.ne.s32.totalorder %s677_s30, 0 }
 0x16a   :  { %681 = shalt.err (%p766_p9)  }
 0x16b   :  { %683 = vsyncmov [#allocation5 + $0x1] }
 0x16e   :  { %s684_s5 = vpop.sfrf %683 }
 0x16f   :  { %p767_p10 = scmp.ne.s32.totalorder %s684_s5, 0 }
 0x171   :  { %688 = shalt.err (%p767_p10)  }
 0x172   :  { %690 = vsyncmov [#allocation5 + $0x2] }
 0x175   :  { %s691_s3 = vpop.sfrf %690 }
 0x176   :  { %p768_p11 = scmp.ne.s32.totalorder %s691_s3, 0 }
 0x178   :  { %695 = shalt.err (%p768_p11)  }
 0x179   :  { %697 = vsyncmov [#allocation5 + $0x3] }
 0x17c   :  { %s698_s6 = vpop.sfrf %697 }
 0x17d   :  { %p769_p12 = scmp.ne.s32.totalorder %s698_s6, 0 }
 0x17f   :  { %702 = shalt.err (%p769_p12)  }

</bundles_post_ra>
